<compile_context>
chip_gen: v7x
topology: tpu7x:2x2x1
jax: 0.10.0
libtpu: 0.0.40
codegen_flags: <defaults>
</compile_context>

<pallas_src>
import jax
import jax.numpy as jnp
from jax.experimental import pallas as pl
from jax.experimental.pallas import tpu as pltpu


def discriminator_kernel(x_ref, w1_ref, b1_ref, w2_ref, b2_ref, o_ref):
    # x arrives as f32 straight from HBM (no wrapper pad / cast passes); the
    # bf16 cast happens here on the VPU.  f32 accumulation on the MXU.
    x_bf = x_ref[...].astype(jnp.bfloat16)
    h = jnp.dot(x_bf, w1_ref[...], preferred_element_type=jnp.float32)
    h = h + b1_ref[...]                         # bias add in f32 ([1, 128] bcast)
    h = jnp.maximum(h, 0.2 * h)                 # LeakyReLU(0.2): one vmul + vmax

    # Layer 2 (out_features = 1): VPU multiply + XLU lane reduction instead of
    # a [tile_b,128]@[128,1] matmul that would occupy a single MXU column.
    logits = jnp.sum(h * w2_ref[...], axis=-1, keepdims=True) + b2_ref[0]

    # Sigmoid: exp and the approximate reciprocal both ride the EUP slot.
    # TODO(synk): output stays [tile_b, 1] (masked stores) to preserve the
    # module's [B, 1] layout; a lane-dense [1, tile_b] layout would need an
    # in-kernel transpose + wrapper reshape for a ~few-% win on the (tiny)
    # output stream.
    o_ref[...] = pl.reciprocal(1.0 + jnp.exp(-logits), approx=True)


def _choose_tile_b(batch, requested):
    """Pick the batch tile.

    As large as requested (amortizes per-step overhead), but:
      * keep >= 2 grid steps when the batch allows it, so the "parallel" batch
        axis can shard across both TensorCores on v7x;
      * keep it a multiple of 8 (sublane) unless it covers the whole batch.
    """
    tb = min(requested, batch)
    if batch >= 16 and pl.cdiv(batch, tb) < 2:
        tb = (batch + 1) // 2
    if tb != batch:
        tb = max(8, (tb // 8) * 8)
    return tb


def discriminator_forward(x, w1, b1, w2, b2, *, tile_b=2048):
    """x: [B, image_dim] f32 -> [B, 1] f32 probability (PyTorch Discriminator)."""
    B, K = x.shape
    H = w1.shape[1]

    # Cap at 4096: a double-buffered f32 x tile of 4096x784 is ~25 MiB, which
    # fits the 32 MiB limit below and leaves headroom on v7x (64 MiB VMEM).
    tile_b = _choose_tile_b(B, min(tile_b, 4096))
    grid = (pl.cdiv(B, tile_b),)

    # Weights / biases are small and VMEM-resident across the whole grid
    # (constant block index), so a one-time wrapper bf16 cast of w1 is cheap
    # and halves its HBM read.  x itself is NOT cast or padded in the wrapper.
    w1_bf = w1.astype(jnp.bfloat16)
    b1_row = b1.reshape(1, H).astype(jnp.float32)
    w2_row = w2.reshape(1, H).astype(jnp.float32)    # second layer as a row
    b2_s = b2.reshape(1).astype(jnp.float32)         # scalar, lives in SMEM

    cost = pl.CostEstimate(
        flops=2 * B * K * H + 2 * B * H,
        bytes_accessed=B * K * 4 + K * H * 2 + (2 * H + 1) * 4 + B * 4,
        transcendentals=B,
    )

    return pl.pallas_call(
        discriminator_kernel,
        out_shape=jax.ShapeDtypeStruct((B, 1), jnp.float32),
        grid_spec=pltpu.PrefetchScalarGridSpec(
            num_scalar_prefetch=0,
            grid=grid,
            in_specs=[
                # x: tiled along batch (f32, unpadded K); double-buffered.
                pl.BlockSpec((tile_b, K), lambda i: (i, 0)),
                # Weights & biases: constant block index -> VMEM-resident.
                pl.BlockSpec((K, H), lambda i: (0, 0)),
                pl.BlockSpec((1, H), lambda i: (0, 0)),
                pl.BlockSpec((1, H), lambda i: (0, 0)),
                # b2: single f32 scalar in SMEM (no padded VMEM tile / DMA stream).
                pl.BlockSpec(memory_space=pltpu.MemorySpace.SMEM),
            ],
            out_specs=pl.BlockSpec((tile_b, 1), lambda i: (i, 0)),
        ),
        compiler_params=pltpu.CompilerParams(
            dimension_semantics=("parallel",),
            # Explicit limit: covers the f32 x double-buffer on v5e's 16 MiB
            # scoped default, safe within v7x's 64 MiB physical VMEM.
            vmem_limit_bytes=32 * 1024 * 1024,
        ),
        cost_estimate=cost,
    )(x, w1_bf, b1_row, w2_row, b2_s)


def init_params(key, image_dim=784, hidden=128):
    # Deterministic init mimicking PyTorch nn.Linear default:
    # U(-1/sqrt(fan_in), 1/sqrt(fan_in)).
    k1, k2, k3, k4 = jax.random.split(key, 4)
    bound1 = 1.0 / jnp.sqrt(image_dim)
    bound2 = 1.0 / jnp.sqrt(hidden)
    w1 = jax.random.uniform(k1, (image_dim, hidden), jnp.float32, -bound1, bound1)
    b1 = jax.random.uniform(k2, (1, hidden), jnp.float32, -bound1, bound1)
    w2 = jax.random.uniform(k3, (hidden, 1), jnp.float32, -bound2, bound2)
    b2 = jax.random.uniform(k4, (1, 1), jnp.float32, -bound2, bound2)
    return w1, b1, w2, b2


if __name__ == "__main__":
    image_dim = 28 * 28
    batch = 64           # small demo batch; tile chooser picks 32 -> 2-step grid

    key = jax.random.PRNGKey(0)
    k_params, k_x = jax.random.split(key)
    w1, b1, w2, b2 = init_params(k_params, image_dim=image_dim, hidden=128)
    x = jax.random.normal(k_x, (batch, image_dim), jnp.float32)

    out = discriminator_forward(x, w1, b1, w2, b2)
    out = jax.block_until_ready(out)

    # Pure-JAX f32 reference of the original module's math.
    h_ref = x @ w1 + b1
    h_ref = jnp.where(h_ref > 0, h_ref, 0.2 * h_ref)
    ref = jax.nn.sigmoid(h_ref @ w2 + b2)

    assert out.shape == (batch, 1)
    # bf16 matmul inputs + approx reciprocal -> compare with a modest tolerance.
    assert jnp.allclose(out, ref, atol=2e-2, rtol=2e-2), (
        float(jnp.max(jnp.abs(out - ref))))

    print("KERNEL_OK")
</pallas_src>

<mosaic_0001>
module attributes {stable_mosaic.version = 11 : i64} {
  func.func @discriminator_kernel(%arg0: i32, %arg1: memref<32x784xf32, #tpu.memory_space<vmem>>, %arg2: memref<784x128xbf16, #tpu.memory_space<vmem>>, %arg3: memref<1x128xf32, #tpu.memory_space<vmem>>, %arg4: memref<1x128xf32, #tpu.memory_space<vmem>>, %arg5: memref<1xf32, #tpu.memory_space<smem>>, %arg6: memref<32x1xf32, #tpu.memory_space<vmem>>) attributes {dimension_semantics = [#tpu.dimension_semantics<parallel>], iteration_bounds = array<i64: 2>, scalar_prefetch = 0 : i64, scratch_operands = 0 : i64, tpu.core_type = #tpu.core_type<tc>, window_params = [{transform_indices = @transform_0, window_bounds = array<i64: 32, 784>}, {pipeline_mode = #tpu.pipeline_mode<synchronous>, transform_indices = @transform_1, window_bounds = array<i64: 784, 128>}, {pipeline_mode = #tpu.pipeline_mode<synchronous>, transform_indices = @transform_2, window_bounds = array<i64: 1, 128>}, {pipeline_mode = #tpu.pipeline_mode<synchronous>, transform_indices = @transform_3, window_bounds = array<i64: 1, 128>}, {transform_indices = @transform_4, window_bounds = array<i64: 1>}, {transform_indices = @transform_5, window_bounds = array<i64: 32, 1>}]} {
    %c0 = arith.constant 0 : index
    %c0_0 = arith.constant 0 : index
    %0 = vector.load %arg1[%c0, %c0_0] : memref<32x784xf32, #tpu.memory_space<vmem>>, vector<32x784xf32>
    %1 = arith.truncf %0 : vector<32x784xf32> to vector<32x784xbf16>
    %c0_1 = arith.constant 0 : index
    %c0_2 = arith.constant 0 : index
    %2 = vector.load %arg2[%c0_1, %c0_2] : memref<784x128xbf16, #tpu.memory_space<vmem>>, vector<784x128xbf16>
    %cst = arith.constant dense<0.000000e+00> : vector<32x128xf32>
    %3 = tpu.matmul %1, %2, %cst {dimension_numbers = #tpu.dot_dimension_numbers<[1], [0], [0], [1], [0, 0, 1, 1], [], []>} : vector<32x784xbf16>, vector<784x128xbf16>, vector<32x128xf32> -> vector<32x128xf32>
    %c0_3 = arith.constant 0 : index
    %c0_4 = arith.constant 0 : index
    %4 = vector.load %arg3[%c0_3, %c0_4] : memref<1x128xf32, #tpu.memory_space<vmem>>, vector<1x128xf32>
    %5 = vector.broadcast %4 : vector<1x128xf32> to vector<32x128xf32>
    %6 = arith.addf %3, %5 : vector<32x128xf32>
    %cst_5 = arith.constant 2.000000e-01 : f32
    %7 = vector.broadcast %cst_5 : f32 to vector<32x128xf32>
    %8 = arith.mulf %7, %6 : vector<32x128xf32>
    %9 = arith.maximumf %6, %8 : vector<32x128xf32>
    %c0_6 = arith.constant 0 : index
    %c0_7 = arith.constant 0 : index
    %10 = vector.load %arg4[%c0_6, %c0_7] : memref<1x128xf32, #tpu.memory_space<vmem>>, vector<1x128xf32>
    %11 = vector.broadcast %10 : vector<1x128xf32> to vector<32x128xf32>
    %12 = arith.mulf %9, %11 : vector<32x128xf32>
    %cst_8 = arith.constant dense<0.000000e+00> : vector<32xf32>
    %13 = vector.multi_reduction <add>, %12, %cst_8 [1] : vector<32x128xf32> to vector<32xf32>
    %14 = vector.shape_cast %13 : vector<32xf32> to vector<32x1xf32>
    %c0_9 = arith.constant 0 : index
    %15 = memref.load %arg5[%c0_9] : memref<1xf32, #tpu.memory_space<smem>>
    %16 = vector.broadcast %15 : f32 to vector<32x1xf32>
    %17 = arith.addf %14, %16 : vector<32x1xf32>
    %cst_10 = arith.constant 0.000000e+00 : f32
    %18 = vector.broadcast %cst_10 : f32 to vector<32x1xf32>
    %19 = arith.subf %18, %17 : vector<32x1xf32>
    %20 = math.exp %19 : vector<32x1xf32>
    %cst_11 = arith.constant 1.000000e+00 : f32
    %21 = vector.broadcast %cst_11 : f32 to vector<32x1xf32>
    %22 = arith.addf %21, %20 : vector<32x1xf32>
    %23 = tpu.reciprocal %22 {approx = true} : vector<32x1xf32> -> vector<32x1xf32>
    %c0_12 = arith.constant 0 : index
    %c0_13 = arith.constant 0 : index
    %24 = vector.load %arg6[%c0_12, %c0_13] : memref<32x1xf32, #tpu.memory_space<vmem>>, vector<32x1xf32>
    tpu.vector_store %arg6[%c0_12, %c0_13], %23 {strides = array<i32>} : memref<32x1xf32, #tpu.memory_space<vmem>>, vector<32x1xf32>,
    return
  }
  func.func @transform_0(%arg0: i32) -> (i32, i32) {
    %c0_i32 = arith.constant 0 : i32
    %c0_i32_0 = arith.constant 0 : i32
    return %arg0, %c0_i32 : i32, i32
  }
  func.func @transform_1(%arg0: i32) -> (i32, i32) {
    %c0_i32 = arith.constant 0 : i32
    %c0_i32_0 = arith.constant 0 : i32
    %c0_i32_1 = arith.constant 0 : i32
    return %c0_i32, %c0_i32_0 : i32, i32
  }
  func.func @transform_2(%arg0: i32) -> (i32, i32) {
    %c0_i32 = arith.constant 0 : i32
    %c0_i32_0 = arith.constant 0 : i32
    %c0_i32_1 = arith.constant 0 : i32
    return %c0_i32, %c0_i32_0 : i32, i32
  }
  func.func @transform_3(%arg0: i32) -> (i32, i32) {
    %c0_i32 = arith.constant 0 : i32
    %c0_i32_0 = arith.constant 0 : i32
    %c0_i32_1 = arith.constant 0 : i32
    return %c0_i32, %c0_i32_0 : i32, i32
  }
  func.func @transform_4(%arg0: i32) -> i32 {
    %c0_i32 = arith.constant 0 : i32
    %c0_i32_0 = arith.constant 0 : i32
    return %c0_i32 : i32
  }
  func.func @transform_5(%arg0: i32) -> (i32, i32) {
    %c0_i32 = arith.constant 0 : i32
    %c0_i32_0 = arith.constant 0 : i32
    return %arg0, %c0_i32 : i32, i32
  }
}

</mosaic_0001>

<bundles_post_ra>
// kernel: tpu_custom_call.1
= control target key start
LH: loop header
LB: loop body
LE: loop exit
PB: predicated region body
PF: predicated region fallthrough
CT: control target
= control target key end

     0   :  { %s1644_s0 = inlined_call_operand.hbm [shape: f32[64,784], index: 0, kind: input, shape index: {}]   ;;  %s1645_s1 = inlined_call_operand.hbm [shape: bf16[784,128], index: 1, kind: input, shape index: {}]   ;;  %s1646_s2 = inlined_call_operand.vmem [shape: f32[1,128], index: 2, kind: input, shape index: {}]   ;;  %s1647_s3 = inlined_call_operand.vmem [shape: f32[1,128], index: 3, kind: input, shape index: {}]   ;;  %s1648_s4 = inlined_call_operand.<no memory space> [shape: f32[1], index: 4, kind: input, shape index: {}]   ;;  %s1649_s5 = inlined_call_operand.vmem [shape: f32[64,1], index: 5, kind: output, shape index: {}]  }
   0x1   :  { %10 = sst [smem:[#allocation2]] %s1648_s4 }
   0x2   :  { %11 = vsyncpa [#allocation4], 0 }
   0x3   :  { %13 = vsyncpa [#allocation4 + $0x1], 0 }
   0x4   :  { %14 = vsyncpa [#allocation6], 0  ;;  %s1463_s20 = smov 0   ;;  %s1465_s21 = smov 0  }
   0x5   :  { %s1467_s22 = smov 0   ;;  %s1469_s23 = smov 0  }
   0x6 LB: > { %s1044_s4 = sadd.s32 4294967295, %s1422_s23   ;;  %p40_p0 = scmp.ne.s32.totalorder %s1414_s21, %s1410_s20  ;;  %s1422_s23 = sphi %s1469_s23, %s1666_s23   ;;  %s1418_s22 = sphi %s1467_s22, %s1665_s22   ;;  %s1414_s21 = sphi %s1465_s21, %s1664_s21   ;;  %s1410_s20 = sphi %s1463_s20, %s1663_s20  }
   0x7   : > { %p1485_p1 = scmp.eq.s32.totalorder %s1044_s4, 0  ;;  %p1046_p2 = scmp.ge.s32.totalorder %s1422_s23, 1 }
   0x8   : > { %p161_p3 = scmp.lt.s32.totalorder %s1422_s23, 3  ;;  %s1424_s27 = smov [#allocation5]  }
   0x9   : > { %s1654_s24 = scalar_select %p1485_p1, 1, 0 }
   0xa   : > { %p1493_p4 = por %p1485_p1, %p40_p0  ;;  %p1497_p5 = pnand %p1046_p2, %p161_p3 }
   0xb   : > { %s173_s28 = sshll.u32 %s1424_s27, 4  ;;  %s1510_s30 = sadd.s32 1, %s1422_s23   ;;  %s174_s28 = int_to_ptr.vmem [resolvable:$true] %s173_s28 }
   0xc   : > { %s1655_s25 = scalar_select %p1493_p4, 1, 0 }
   0xd   : > { %s1656_s26 = scalar_select %p1497_p5, 1, 0 }
   0xe   : > { %p1213_p6 = pneg %p1497_p5  ;;  %s27_s6 = sadd.s32 1, %s1418_s22 }
   0xf   : > { %s24_s7 = ssub.s32 %s1422_s23, %s1510_s30  ;;  %s1326_s10 = scalar_lea.hbm %s1645_s1, 6272 }
  0x10   : > { %p1505_p7 = pnand %p1213_p6, %p1485_p1  ;;  %p1327_p8 = scmp.ne.s32.totalorder %s1645_s1, %s1326_s10 }
  0x11   : > { %p1333_p12 = scmp.lt.u32.totalorder %s1326_s10, %s1645_s1 }
  0x12   : > { %p1328_p9 = pneg %p1505_p7 }
  0x14   : > { %p1329_p10 = pnand %p1328_p9, %p1327_p8 }
  0x16   : > { %p1330_p11 = pneg %p1329_p10 }
  0x18   : > { %p1335_p13 = pnand %p1333_p12, %p1330_p11 }
  0x1a   : > { %1338 = shalt.err (!%p1335_p13)
}
  0x1b   : > { %s1339_s15 = scalar_lea.vmem %s174_s28, 6272  ;;  %p1347_p6 = scmp.lt.s32.totalorder %s174_s28, %s174_s28 }
  0x1c   : > { %p1340_p0 = scmp.ne.s32.totalorder %s174_s28, %s1339_s15  ;;  %p1348_p1 = scmp.lt.s32.totalorder %s1339_s15, %s1339_s15 }
  0x1e   : > { %p1342_p2 = pnand %p1340_p0, %p1328_p9  ;;  %p1349_p4 = por %p1348_p1, %p1347_p6 }
  0x20   : > { %p1343_p3 = pneg %p1342_p2 }
  0x22   : > { %p1350_p5 = pnand %p1349_p4, %p1343_p3 }
  0x24   : > { %1353 = shalt.err (!%p1350_p5)
}
  0x25   : > { %s1425_s16 = smov 64   ;;  %s1426_s17 = smov 4  }
  0x26   : > { %1216 = dma.hbm_to_vmem [thread:$0]  (!%p1505_p7), %s1645_s1, 6272, %s174_s28, [#allocation6], %s1425_s16, %s1425_s16, %s1426_s17  }
  0x27   : > { %p25_p8 = scmp.eq.s32.totalorder %s24_s7, 0  ;;  %p34_p9 = scmp.ne.s32.totalorder %s1418_s22, %s1414_s21 }
  0x28   : > { %p35_p1 = scmp.eq.s32.totalorder %s1422_s23, 0  ;;  %p1222_p4 = scmp.lt.s32.totalorder %s1422_s23, 2 }
  0x29   : > { %s1536_s20 = scalar_select %p25_p8, %s1418_s22, %s27_s6  }
  0x2a   : > { %p36_p5 = por %p35_p1, %p34_p9  ;;  %s196_s27 = sand.u32 1, %s1418_s22  }
  0x2b   : > { %s1204_s8 = smul.u32 224, %s196_s27  ;;  %s1551_s12 = scalar_lea.sflag [#allocation4], %s196_s27 }
  0x2c   : > { %s1205_s9 = smul.u32 3584, %s1422_s23  ;;  %p1540_p10 = pnand %p1222_p4, %p36_p5 }
  0x2d   : > { %s200_s6 = scalar_lea.vmem [#allocation3], %s1204_s8  ;;  %s1359_s16 = scalar_lea.hbm %s1644_s0, 7168 }
  0x2e   : > { %s1547_s28 = scalar_lea.hbm %s1644_s0, %s1205_s9  ;;  %s208_s7 = sshll.u32 %s200_s6, 4  ;;  %s1549_s7 = int_to_ptr.vmem [resolvable:$true] %s208_s7 }
  0x2f   : > { %s1354_s13 = scalar_lea.hbm %s1547_s28, 3584  ;;  %p1356_p11 = pneg %p1540_p10 }
  0x30   : > { %p1355_p7 = scmp.ne.s32.totalorder %s1547_s28, %s1354_s13  ;;  %p1360_p0 = scmp.lt.u32.totalorder %s1547_s28, %s1644_s0 }
  0x31   : > { %p1361_p2 = scmp.lt.u32.totalorder %s1359_s16, %s1354_s13  ;;  %p1363_p6 = scmp.lt.u32.totalorder %s1354_s13, %s1547_s28 }
  0x32   : > { %p1357_p12 = pnand %p1356_p11, %p1355_p7 }
  0x33   : > { %p1362_p3 = por %p1361_p2, %p1360_p0 }
  0x34   : > { %p1358_p13 = pneg %p1357_p12 }
  0x35   : > { %p1364_p8 = por %p1363_p6, %p1362_p3 }
  0x37   : > { %p1365_p9 = pnand %p1364_p8, %p1358_p13 }
  0x39   : > { %1368 = shalt.err (!%p1365_p9)
}
  0x3a   : > { %s1369_s19 = scalar_lea.vmem %s1549_s7, 3584  ;;  %s1427_s27 = smov [#allocation3]  }
  0x3b   : > { %p1370_p1 = scmp.ne.s32.totalorder %s1549_s7, %s1369_s19  ;;  %s1374_s8 = sshll.u32 %s1427_s27, 4  ;;  %s1375_s8 = int_to_ptr.vmem [resolvable:$false] %s1374_s8 }
  0x3c   : > { %s1376_s9 = scalar_lea.vmem %s1375_s8, 7168  ;;  %p1377_p7 = scmp.lt.s32.totalorder %s1549_s7, %s1375_s8 }
  0x3d   : > { %p1372_p4 = pnand %p1370_p1, %p1356_p11  ;;  %p1378_p12 = scmp.lt.s32.totalorder %s1376_s9, %s1369_s19 }
  0x3f   : > { %p1373_p5 = pneg %p1372_p4  ;;  %p1379_p0 = por %p1378_p12, %p1377_p7 }
  0x41   : > { %p1380_p2 = pnand %p1379_p0, %p1373_p5 }
  0x43   : > { %1383 = shalt.err (!%p1380_p2)
}
  0x44   : > { %s1428_s11 = smov 896   ;;  %s1429_s29 = smov 56  }
  0x45   : > { %1220 = dma.hbm_to_vmem [thread:$0]  (!%p1540_p10), %s1547_s28, 3584, %s1549_s7, %s1551_s12, %s1428_s11, %s1428_s11, %s1429_s29  }
  0x46   : > { %p1659_p11 = scmp.ne.s32.totalorder %s1656_s26, 0 }
  0x47   : > { %s222_s6 = sand.u32 (!%p1659_p11), 1, %s1414_s21   ;;  %p1660_p13 = scmp.ne.s32.totalorder (!%p1659_p11), %s1655_s25, 0 }
  0x48   : > { %220 = sbr.rel (%p1659_p11) target bundleno = 558 (0x22e), region = 40  ;;  %s223_s14 = scalar_lea.sflag (!%p1659_p11), [#allocation4], %s222_s6 }
  0x49   : > { %s1206_s13 = smul.u32 (!%p1659_p11), 224, %s222_s6 }
  0x4b   : > { %s1582_s15 = scalar_lea.vmem (!%p1659_p11), [#allocation3], %s1206_s13 }
  0x4f   : > { %1401 = dma.done.wait (%p1660_p13), %s223_s14, 3584  }
  0x50   : > { %1403 = vsyncadd (%p1660_p13), %s223_s14, 4294963712  ;;  %p1661_p3 = scmp.ne.s32.totalorder %s1654_s24, 0 }
  0x52   : > { %1405 = dma.done.wait (%p1661_p3), [#allocation6], 6272  }
  0x53   : > { %1407 = vsyncadd (%p1661_p3), [#allocation6], 4294961024  ;;  %v1261_v0 = vld [vmem:[#allocation5 + $0x40] sm:$0xff]   ;;  %v1265_v4 = vld [vmem:[#allocation5 + $0x48] sm:$0xff]   ;;  %vm706_vm0 = vcmask 130048   ;;  %s936_s28 = sld [smem:[#allocation2]] }
  0x54   : > { %v1262_v1 = vld [vmem:[#allocation5] sm:$0xff]   ;;  %1111 = vmatprep.subr.bf16.mxu0 %v1261_v0  ;;  %v1266_v5 = vld [vmem:[#allocation5 + $0x8] sm:$0xff]   ;;  %v1269_v8 = vld [vmem:[#allocation5 + $0x50] sm:$0xff]   ;;  %s1054_s7 = sshll.u32 %s1044_s4, 2  ;;  %vm962_vm1 = vcmask 7168  }
  0x55   : > { %v1263_v2 = vld [vmem:[#allocation5 + $0xc0] sm:$0xff]   ;;  %1112 = vmatpush3.bf16.msra.mxu0 %v1262_v1  ;;  %v1267_v6 = vld [vmem:[#allocation5 + $0xc8] sm:$0xff]   ;;  %v1270_v9 = vld [vmem:[#allocation5 + $0x10] sm:$0xff]   ;;  %p259_p10 = scmp.lt.s32.totalorder %s1054_s7, 7 }
  0x56   : > { %v1264_v3 = vld [vmem:[#allocation5 + $0x80] sm:$0xff]   ;;  %1139 = vmatprep.subr.bf16.mxu1 %v1263_v2  ;;  %1113 = vmatprep.subr.bf16.mxu0 %v1265_v4  ;;  %v1268_v7 = vld [vmem:[#allocation5 + $0x88] sm:$0xff]   ;;  %v1271_v10 = vld [vmem:[#allocation5 + $0xd0] sm:$0xff]  }
  0x57   : > { %1140 = vmatpush3.bf16.msra.mxu1 %v1264_v3  ;;  %v1272_v11 = vld [vmem:[#allocation5 + $0x90] sm:$0xff]   ;;  %v1273_v12 = vld [vmem:[#allocation5 + $0x58] sm:$0xff]   ;;  %v1277_v16 = vld [vmem:[#allocation5 + $0x60] sm:$0xff]   ;;  %s1668_s7 = smov (!%p259_p10, %s1054_s7), 7 }
  0x58   : > { %1141 = vmatprep.subr.bf16.mxu1 %v1267_v6  ;;  %v1274_v13 = vld [vmem:[#allocation5 + $0x18] sm:$0xff]   ;;  %v1278_v17 = vld [vmem:[#allocation5 + $0x20] sm:$0xff]   ;;  %v1281_v20 = vld [vmem:[#allocation5 + $0x68] sm:$0xff]   ;;  %s1055_s12 = sshll.u32 %s1668_s7, 3 }
  0x59   : > { %1114 = vmatpush3.bf16.msra.mxu0 %v1266_v5  ;;  %v1275_v14 = vld [vmem:[#allocation5 + $0xd8] sm:$0xff]   ;;  %v1279_v18 = vld [vmem:[#allocation5 + $0xe0] sm:$0xff]   ;;  %v1282_v21 = vld [vmem:[#allocation5 + $0x28] sm:$0xff]   ;;  %s262_s23 = scalar_lea.vmem %s1649_s5, %s1055_s12 }
  0x5a   : > { %1115 = vmatprep.subr.bf16.mxu0 %v1269_v8  ;;  %v1276_v15 = vld [vmem:[#allocation5 + $0x98] sm:$0xff]   ;;  %v1280_v19 = vld [vmem:[#allocation5 + $0xa0] sm:$0xff]   ;;  %v1283_v22 = vld [vmem:[#allocation5 + $0xe8] sm:$0xff]  }
  0x5b   : > { %1142 = vmatpush3.bf16.msra.mxu1 %v1268_v7  ;;  %v1284_v23 = vld [vmem:[#allocation5 + $0xa8] sm:$0xff]   ;;  %v1285_v24 = vld [vmem:[#allocation5 + $0x70] sm:$0xff]   ;;  %v1289_v28 = vld [vmem:[#allocation5 + $0x78] sm:$0xff]  }
  0x5c   : > { %1143 = vmatprep.subr.bf16.mxu1 %v1271_v10  ;;  %v1286_v25 = vld [vmem:[#allocation5 + $0x30] sm:$0xff]   ;;  %v1290_v29 = vld [vmem:[#allocation5 + $0x38] sm:$0xff]   ;;  %v266_v31 = vld [vmem:[%s1582_s15 + $0x8] sm:$0xff] }
  0x5d   : > { %1116 = vmatpush3.bf16.msra.mxu0 %v1270_v9  ;;  %v1287_v26 = vld [vmem:[#allocation5 + $0xf0] sm:$0xff]   ;;  %v1291_v30 = vld [vmem:[#allocation5 + $0xf8] sm:$0xff]   ;;  %v273_v32 = vld [vmem:[%s1582_s15 + $0x40] sm:$0xff] }
  0x5e   : > { %1117 = vmatprep.subr.bf16.mxu0 %v1273_v12  ;;  %v1288_v27 = vld [vmem:[#allocation5 + $0xb0] sm:$0xff]   ;;  %v294_v33 = vpack.c.bf16 %v273_v32, %v266_v31  ;;  %v1292_v34 = vld [vmem:[#allocation5 + $0xb8] sm:$0xff]   ;;  %v265_v35 = vld [vmem:[%s1582_s15] sm:$0xff] }
  0x5f   : > { %1144 = vmatpush3.bf16.msra.mxu1 %v1272_v11  ;;  %v272_v36 = vld [vmem:[%s1582_s15 + $0x38] sm:$0xff]  ;;  %v1293_v38 = vld [vmem:[#allocation5 + $0x140] sm:$0xff]   ;;  %v275_v40 = vld [vmem:[%s1582_s15 + $0x50] sm:$0xff] }
  0x60   : > { %1145 = vmatprep.subr.bf16.mxu1 %v1275_v14  ;;  %745 = vmatprep.mubr.bf16.mxu0 %v294_v33  ;;  %v293_v37 = vpack.c.bf16 %v272_v36, %v265_v35  ;;  %v268_v39 = vld [vmem:[%s1582_s15 + $0x18] sm:$0xff]  ;;  %v1294_v42 = vld [vmem:[#allocation5 + $0x100] sm:$0xff]   ;;  %v267_v43 = vld [vmem:[%s1582_s15 + $0x10] sm:$0xff] }
  0x61   : > { %1118 = vmatpush3.bf16.msra.mxu0 %v1274_v13  ;;  %v296_v41 = vpack.c.bf16 %v275_v40, %v268_v39  ;;  %v274_v44 = vld [vmem:[%s1582_s15 + $0x48] sm:$0xff]  ;;  %v1297_v48 = vld [vmem:[#allocation5 + $0x150] sm:$0xff]   ;;  %v1299_v50 = vld [vmem:[#allocation5 + $0x158] sm:$0xff]  }
  0x62   : > { %1119 = vmatprep.subr.bf16.mxu0 %v1277_v16  ;;  %v295_v45 = vpack.c.bf16 %v274_v44, %v267_v43  ;;  %v1295_v46 = vld [vmem:[#allocation5 + $0x148] sm:$0xff]   ;;  %v1298_v49 = vld [vmem:[#allocation5 + $0x110] sm:$0xff]   ;;  %v1300_v51 = vld [vmem:[#allocation5 + $0x118] sm:$0xff]  }
  0x63   : > { %1146 = vmatpush3.bf16.msra.mxu1 %v1276_v15  ;;  %794 = vmatprep.mubr.bf16.mxu1 %v296_v41  ;;  %v1296_v47 = vld [vmem:[#allocation5 + $0x108] sm:$0xff]   ;;  %v280_v52 = vld [vmem:[%s1582_s15 + $0x78] sm:$0xff]  ;;  %v287_v53 = vld [vmem:[%s1582_s15 + $0xb0] sm:$0xff] }
  0x64   : > { %1147 = vmatprep.subr.bf16.mxu1 %v1279_v18  ;;  %v1301_v54 = vld [vmem:[#allocation5 + $0x160] sm:$0xff]   ;;  %v301_v55 = vpack.c.bf16 %v287_v53, %v280_v52  ;;  %v279_v56 = vld [vmem:[%s1582_s15 + $0x70] sm:$0xff]  ;;  %v286_v57 = vld [vmem:[%s1582_s15 + $0xa8] sm:$0xff] }
  0x65   : > { %1120 = vmatpush3.bf16.msra.mxu0 %v1278_v17  ;;  %v1302_v58 = vld [vmem:[#allocation5 + $0x120] sm:$0xff]   ;;  %v300_v59 = vpack.c.bf16 %v286_v57, %v279_v56  ;;  %v282_v60 = vld [vmem:[%s1582_s15 + $0x88] sm:$0xff]  ;;  %v288_v0 = vld [vmem:[%s1582_s15 + $0xb8] sm:$0xff] }
  0x66   : > { %1121 = vmatprep.subr.bf16.mxu0 %v1281_v20  ;;  %v289_v61 = vld [vmem:[%s1582_s15 + $0xc0] sm:$0xff]  ;;  %v1303_v1 = vld [vmem:[#allocation5 + $0x168] sm:$0xff]   ;;  %v1305_v5 = vld [vmem:[#allocation5 + $0x170] sm:$0xff]  }
  0x67   : > { %1148 = vmatpush3.bf16.msra.mxu1 %v1280_v19  ;;  %v281_v62 = vld [vmem:[%s1582_s15 + $0x80] sm:$0xff]  ;;  %v303_v63 = vpack.c.bf16 %v289_v61, %v282_v60  ;;  %v1304_v4 = vld [vmem:[#allocation5 + $0x128] sm:$0xff]   ;;  %v271_v9 = vld [vmem:[%s1582_s15 + $0x30] sm:$0xff] }
  0x68   : > { %1149 = vmatprep.subr.bf16.mxu1 %v1283_v22  ;;  %v302_v2 = vpack.c.bf16 %v288_v0, %v281_v62  ;;  %v1307_v3 = vld [vmem:[#allocation5 + $0x180] sm:$0xff]   ;;  %v270_v6 = vld [vmem:[%s1582_s15 + $0x28] sm:$0xff]  ;;  %v292_v12 = vld [vmem:[%s1582_s15 + $0xd8] sm:$0xff] }
  0x69   : > { %1122 = vmatpush3.bf16.msra.mxu0 %v1282_v21  ;;  %v277_v7 = vld [vmem:[%s1582_s15 + $0x60] sm:$0xff]  ;;  %v278_v10 = vld [vmem:[%s1582_s15 + $0x68] sm:$0xff]  ;;  %v1306_v13 = vld [vmem:[#allocation5 + $0x130] sm:$0xff]  }
  0x6a   : > { %1123 = vmatprep.subr.bf16.mxu0 %v1285_v24  ;;  %v298_v8 = vpack.c.bf16 %v277_v7, %v270_v6  ;;  %v285_v11 = vld [vmem:[%s1582_s15 + $0xa0] sm:$0xff]  ;;  %v299_v14 = vpack.c.bf16 %v278_v10, %v271_v9  ;;  %v1308_v16 = vld [vmem:[#allocation5 + $0x178] sm:$0xff]   ;;  %v291_v21 = vld [vmem:[%s1582_s15 + $0xd0] sm:$0xff] }
  0x6b   : > { %1150 = vmatpush3.bf16.msra.mxu1 %v1284_v23  ;;  %v306_v15 = vpack.c.bf16 %v292_v12, %v285_v11  ;;  %v1309_v17 = vld [vmem:[#allocation5 + $0x138] sm:$0xff]   ;;  %v269_v18 = vld [vmem:[%s1582_s15 + $0x20] sm:$0xff]  ;;  %v283_v24 = vld [vmem:[%s1582_s15 + $0x90] sm:$0xff] }
  0x6c   : > { %1151 = vmatprep.subr.bf16.mxu1 %v1287_v26  ;;  %v276_v19 = vld [vmem:[%s1582_s15 + $0x58] sm:$0xff] }
  0x6d   : > { %1124 = vmatpush3.bf16.msra.mxu0 %v1286_v25  ;;  %v284_v20 = vld [vmem:[%s1582_s15 + $0x98] sm:$0xff]  ;;  %v297_v22 = vpack.c.bf16 %v276_v19, %v269_v18  ;;  %v290_v25 = vld [vmem:[%s1582_s15 + $0xc8] sm:$0xff] }
  0x6e   : > { %1125 = vmatprep.subr.bf16.mxu0 %v1289_v28  ;;  %v305_v23 = vpack.c.bf16 %v291_v21, %v284_v20  ;;  %v304_v26 = vpack.c.bf16 %v290_v25, %v283_v24  ;;  %v1056_v28 = vld [vmem:[%s1646_s2] ss:$0 sm:$0xff] }
  0x6f   : > { %1152 = vmatpush3.bf16.msra.mxu1 %v1288_v27 }
  0x70   : > { %1153 = vmatprep.subr.bf16.mxu1 %v1291_v30 }
  0x71   : > { %1126 = vmatpush3.bf16.msra.mxu0 %v1290_v29 }
  0x72   : > { %1167 = vmatprep.subr.bf16.mxu0 %v1293_v38 }
  0x73   : > { %1154 = vmatpush3.bf16.msra.mxu1 %v1292_v34 }
  0x74   : > { %746 = vmatmul.mubr.bf16.vlgmr.msra.gmra.mrb[0].mxu0 %v293_v37  ;;  %1198 = vmatprep.subr.bf16.mxu1 %v1307_v3 }
  0x75   : > { %1168 = vmatpush3.bf16.msra.mxu0 %v1294_v42  ;;  %753 = vmatprep.mubr.bf16.mxu0 %v301_v55 }
  0x76   : > { %795 = vmatmul.mubr.bf16.vlgmr.msra.gmra.mrb[0].mxu1 %v295_v45  ;;  %1169 = vmatprep.subr.bf16.mxu0 %v1295_v46 }
  0x77   : > { %802 = vmatprep.mubr.bf16.mxu1 %v303_v63  ;;  %1199 = vmatpush3.bf16.msra.mxu1 %v1307_v3 }
  0x79   : > { %1170 = vmatpush3.bf16.msra.mxu0 %v1296_v47 }
  0x7a   : > { %1171 = vmatprep.subr.bf16.mxu0 %v1297_v48 }
  0x7c   : > { %754 = vmatmul.mubr.bf16.gmra.mrb[4].mxu0 %v300_v59 }
  0x7d   : > { %1172 = vmatpush3.bf16.msra.mxu0 %v1298_v49  ;;  %843 = vmatprep.mubr.bf16.mxu0 %v298_v8 }
  0x7e   : > { %1173 = vmatprep.subr.bf16.mxu0 %v1299_v50  ;;  %803 = vmatmul.mubr.bf16.gmra.mrb[4].mxu1 %v302_v2 }
  0x7f   : > { %1200 = vmatprep.mubr.msk.bf16.mxu1 %vm706_vm0, %v299_v14 }
  0x81   : > { %1174 = vmatpush3.bf16.msra.mxu0 %v1300_v51 }
  0x82   : > { %1175 = vmatprep.subr.bf16.mxu0 %v1301_v54 }
  0x85   : > { %1176 = vmatpush3.bf16.msra.mxu0 %v1302_v58 }
  0x86   : > { %1177 = vmatprep.subr.bf16.mxu0 %v1303_v1  ;;  %1201 = vmatmul.mubr.msk.bf16.vlgmr.msra.gmra.mrb[8].mxu1 %vm706_vm0, %v306_v15 }
  0x89   : > { %1178 = vmatpush3.bf16.msra.mxu0 %v1304_v4 }
  0x8a   : > { %1179 = vmatprep.subr.bf16.mxu0 %v1305_v5 }
  0x8d   : > { %1180 = vmatpush3.bf16.msra.mxu0 %v1306_v13  ;;  %v1108_v13 = vld [vmem:[%s1647_s3] ss:$0 sm:$0xff] }
  0x8e   : > { %1181 = vmatprep.subr.bf16.mxu0 %v1308_v16 }
  0x91   : > { %1182 = vmatpush3.bf16.msra.mxu0 %v1309_v17 }
  0x94   : > { %844 = vmatmul.mubr.bf16.vlgmr.msra.gmra.mrb[8].mxu0 %v297_v22 }
  0x95   : > { %851 = vmatprep.mubr.bf16.mxu0 %v305_v23 }
  0x9c   : > { %852 = vmatmul.mubr.bf16.gmra.mrb[12].mxu0 %v304_v26 }
 0x147   : > { %v1127_v27 = vpop.f32.mrb[0].mxu0 }
 0x148   : > { %v1128_v29 = vpop.f32.mrb[1].mxu0 }
 0x149   : > { %v1129_v30 = vadd.f32 %v1128_v29, %v1127_v27  ;;  %v1130_v31 = vpop.f32.mrb[2].mxu0  ;;  %v1155_v32 = vpop.f32.mrb[0].mxu1 }
 0x14a   : > { %v1131_v33 = vpop.f32.mrb[3].mxu0  ;;  %v1156_v36 = vpop.f32.mrb[1].mxu1 }
 0x14b   : > { %v748_v34 = vadd.f32 %v1129_v30, %v1056_v28  ;;  %v1132_v35 = vadd.f32 %v1131_v33, %v1130_v31  ;;  %v1157_v37 = vadd.f32 %v1156_v36, %v1155_v32  ;;  %v1158_v38 = vpop.f32.mrb[2].mxu1  ;;  %v937_v33 = vstv %s936_s28 }
 0x14c   : > { %v1159_v40 = vpop.f32.mrb[3].mxu1 }
 0x14d   : > { %v751_v39 = vadd.f32 %v1132_v35, %v1056_v28  ;;  %v797_v41 = vadd.f32 %v1157_v37, %v748_v34  ;;  %v1160_v42 = vadd.f32 %v1159_v40, %v1158_v38 }
 0x14f   : > { %v800_v43 = vadd.f32 %v1160_v42, %v751_v39  ;;  %v1133_v44 = vpop.f32.mrb[4].mxu0 }
 0x150   : > { %v1134_v45 = vpop.f32.mrb[5].mxu0 }
 0x151   : > { %v1135_v46 = vadd.f32 %v1134_v45, %v1133_v44  ;;  %v1136_v47 = vpop.f32.mrb[6].mxu0  ;;  %v1161_v48 = vpop.f32.mrb[4].mxu1 }
 0x152   : > { %v1137_v49 = vpop.f32.mrb[7].mxu0  ;;  %v1162_v50 = vpop.f32.mrb[5].mxu1 }
 0x153   : > { %v756_v51 = vadd.f32 %v1135_v46, %v1056_v28  ;;  %v1138_v52 = vadd.f32 %v1137_v49, %v1136_v47  ;;  %v1163_v53 = vadd.f32 %v1162_v50, %v1161_v48  ;;  %v1164_v54 = vpop.f32.mrb[6].mxu1 }
 0x154   : > { %v1165_v55 = vpop.f32.mrb[7].mxu1 }
 0x155   : > { %v759_v56 = vadd.f32 %v1138_v52, %v1056_v28  ;;  %v805_v57 = vadd.f32 %v1163_v53, %v756_v51  ;;  %v1166_v58 = vadd.f32 %v1165_v55, %v1164_v54 }
 0x157   : > { %v808_v59 = vadd.f32 %v1166_v58, %v759_v56 }
 0x159   : > { %v1202_v60 = vpop.f32.mrb[8].mxu1 }
 0x15a   : > { %v894_v61 = vpop.f32.mrb[9].mxu1 }
 0x15b   : > { %v1203_v62 = vpop.f32.mrb[10].mxu1 }
 0x15c   : > { %v897_v63 = vpop.f32.mrb[11].mxu1 }
 0x167   : > { %v1183_v0 = vpop.f32.mrb[8].mxu0 }
 0x168   : > { %v1184_v1 = vpop.f32.mrb[9].mxu0 }
 0x169   : > { %v1185_v2 = vadd.f32 %v1184_v1, %v1183_v0  ;;  %v1186_v3 = vpop.f32.mrb[10].mxu0 }
 0x16a   : > { %v1187_v4 = vpop.f32.mrb[11].mxu0 }
 0x16b   : > { %v1188_v5 = vadd.f32 %v1187_v4, %v1186_v3  ;;  %v846_v6 = vadd.f32 %v1185_v2, %v797_v41 }
 0x16d   : > { %v895_v7 = vadd.f32 %v894_v61, %v846_v6  ;;  %v849_v8 = vadd.f32 %v1188_v5, %v800_v43 }
 0x16f   : > { %v909_v9 = vmul.f32 0.2, %v895_v7  ;;  %v898_v10 = vadd.f32 %v897_v63, %v849_v8  ;;  %v1189_v11 = vpop.f32.mrb[12].mxu0 }
 0x170   : > { %v1190_v12 = vpop.f32.mrb[13].mxu0 }
 0x171   : > { %v910_v14 = vmul.f32 0.2, %v898_v10  ;;  %v1191_v15 = vadd.f32 %v1190_v12, %v1189_v11  ;;  %v1192_v16 = vpop.f32.mrb[14].mxu0  ;;  %v913_v17 = vmax.f32 %v895_v7, %v909_v9 }
 0x172   : > { %v1193_v18 = vpop.f32.mrb[15].mxu0 }
 0x173   : > { %v914_v19 = vmax.f32 %v898_v10, %v910_v14  ;;  %v854_v20 = vadd.f32 %v1191_v15, %v805_v57  ;;  %v1194_v21 = vadd.f32 %v1193_v18, %v1192_v16  ;;  %v924_v22 = vmul.f32 %v1108_v13, %v913_v17 }
 0x175   : > { %v857_v23 = vadd.f32 %v1194_v21, %v808_v59  ;;  %928 = vadd.xlane.f32.xlu0 %v924_v22  ;;  %v903_v24 = vadd.f32 %v1202_v60, %v854_v20  ;;  %v925_v26 = vmul.f32 %v1108_v13, %v914_v19 }
 0x177   : > { %v906_v25 = vadd.f32 %v1203_v62, %v857_v23  ;;  %v911_v27 = vmul.f32 0.2, %v903_v24 }
 0x179   : > { %930 = vadd.xlane.f32.xlu0 %v925_v26  ;;  %v915_v28 = vmax.f32 %v903_v24, %v911_v27  ;;  %v912_v29 = vmul.f32 0.2, %v906_v25 }
 0x17b   : > { %v926_v30 = vmul.f32 %v1108_v13, %v915_v28  ;;  %v916_v31 = vmax.f32 %v906_v25, %v912_v29 }
 0x17d   : > { %932 = vadd.xlane.f32.xlu1 %v926_v30  ;;  %v927_v32 = vmul.f32 %v1108_v13, %v916_v31 }
 0x181   : > { %934 = vadd.xlane.f32.xlu1 %v927_v32 }
 0x202   : > { %v929_v34 = vpop.xlane.xlu0 %928 }
 0x203   : > { %v938_v35 = vadd.f32 %v937_v33, %v929_v34 }
 0x205   : > { %v942_v36 = vsub.f32 0.0, %v938_v35 }
 0x206   : > { %v931_v37 = vpop.xlane.xlu0 %930 }
 0x207   : > { %v946_v38 = vmul.f32 1.442695, %v942_v36  ;;  %v939_v39 = vadd.f32 %v937_v33, %v931_v37 }
 0x209   : > { %1310 = vpow2.f32 %v946_v38  ;;  %v943_v40 = vsub.f32 0.0, %v939_v39 }
 0x20a   : > { %v933_v41 = vpop.xlane.xlu1 %932 }
 0x20b   : > { %v948_v42 = vmul.f32 1.442695, %v943_v40  ;;  %v940_v43 = vadd.f32 %v937_v33, %v933_v41 }
 0x20d   : > { %1312 = vpow2.f32 %v948_v42  ;;  %v944_v44 = vsub.f32 0.0, %v940_v43 }
 0x20e   : > { %v935_v45 = vpop.xlane.xlu1 %934 }
 0x20f   : > { %v950_v46 = vmul.f32 1.442695, %v944_v44  ;;  %v941_v47 = vadd.f32 %v937_v33, %v935_v45 }
 0x211   : > { %1314 = vpow2.f32 %v950_v46  ;;  %v945_v48 = vsub.f32 0.0, %v941_v47 }
 0x213   : > { %v1311_v49 = vpop.eup %1310  ;;  %v952_v50 = vmul.f32 1.442695, %v945_v48 }
 0x214   : > { %v954_v51 = vadd.f32 1.0, %v1311_v49 }
 0x215   : > { %1316 = vpow2.f32 %v952_v50 }
 0x216   : > { %1318 = vrcp.f32 %v954_v51 }
 0x217   : > { %v1313_v52 = vpop.eup %1312 }
 0x218   : > { %v955_v53 = vadd.f32 1.0, %v1313_v52 }
 0x21a   : > { %1320 = vrcp.f32 %v955_v53 }
 0x21b   : > { %v1315_v54 = vpop.eup %1314 }
 0x21c   : > { %v956_v55 = vadd.f32 1.0, %v1315_v54 }
 0x21e   : > { %1322 = vrcp.f32 %v956_v55 }
 0x21f   : > { %v1317_v56 = vpop.eup %1316 }
 0x220   : > { %v1319_v57 = vpop.eup %1318  ;;  %v957_v58 = vadd.f32 1.0, %v1317_v56 }
 0x221   : > { %963 = vst.msk [vmem:[%s262_s23] sm:$0xff] %vm962_vm1, %v1319_v57 }
 0x222   : > { %1324 = vrcp.f32 %v957_v58 }
 0x224   : > { %v1321_v59 = vpop.eup %1320 }
 0x225   : > { %964 = vst.msk [vmem:[%s262_s23 + $0x8] sm:$0xff] %vm962_vm1, %v1321_v59 }
 0x228   : > { %v1323_v60 = vpop.eup %1322 }
 0x229   : > { %965 = vst.msk [vmem:[%s262_s23 + $0x10] sm:$0xff] %vm962_vm1, %v1323_v60 }
 0x22c   : > { %v1325_v61 = vpop.eup %1324 }
 0x22d   : > { %966 = vst.msk [vmem:[%s262_s23 + $0x18] sm:$0xff] %vm962_vm1, %v1325_v61 }
 0x22e PF: > { %s1662_s4 = smov %s1536_s20  ;;  %p17_p6 = scmp.ge.s32.totalorder %s1510_s30, 4  }
 0x22f   : > { %s1663_s20 = smov %s1414_s21  ;;  %s1664_s21 = smov %s1418_s22 }
 0x230   : > { %s1665_s22 = smov %s1662_s4  ;;  %s1666_s23 = smov %s1510_s30 }
 0x231   :  { %19 = sbr.rel (!%p17_p6) target bundleno = 6 (0x6), region = 84 }
 0x238   :  { %989 = vsyncpa [#allocation4], 1 }
 0x239   :  { %991 = vsyncpa [#allocation4 + $0x1], 1 }
 0x23a   :  { %992 = vsyncpa [#allocation6], 1 }

</bundles_post_ra>
